<compile_context>
chip_gen: v6e
topology: v6e:2x2x1
jax: 0.10.0
libtpu: 0.0.40
codegen_flags: <defaults>
</compile_context>

<pallas_src>
import functools

import jax
import jax.numpy as jnp
from jax.experimental import pallas as pl
from jax.experimental.pallas import tpu as pltpu


def _round_up(x, m):
    return (x + m - 1) // m * m


def _pick_tile_rows(n, r_total, itemsize, vmem_phys):
    # Resident VMEM per 128-lane row of the (N, R, 128) layout:
    #   streamed inputs : 2 arrays x 2 pipeline buffers x n*128*itemsize
    #   f32 accumulators: 4 arrays                      x n*128*4
    budget = vmem_phys // 8          # generation-aware, leaves ample headroom
    per_row = n * 128 * (4 * itemsize + 4 * 4)
    tile_rows = max(8, budget // per_row)
    tile_rows = min(tile_rows, 1024)
    tile_rows = min(tile_rows, _round_up(r_total, 8))
    return max(8, (tile_rows // 8) * 8)


def bce_dice_kernel(x_ref, t_ref, o_ref,
                    bce_acc, inter_acc, p_acc, t_acc,
                    *, d_valid, needs_mask):
    k = pl.program_id(0)

    @pl.when(k == 0)
    def _init():
        bce_acc[...] = jnp.zeros_like(bce_acc)
        inter_acc[...] = jnp.zeros_like(inter_acc)
        p_acc[...] = jnp.zeros_like(p_acc)
        t_acc[...] = jnp.zeros_like(t_acc)

    x = x_ref[...].astype(jnp.float32)      # (N, TILE_ROWS, 128) logits
    t = t_ref[...].astype(jnp.float32)      # (N, TILE_ROWS, 128) targets

    # One transcendental per element, reused by both BCE and sigmoid.
    e = jnp.exp(-jnp.abs(x))
    inv_1pe = 1.0 / (1.0 + e)
    p = jnp.where(x >= 0.0, inv_1pe, e * inv_1pe)            # sigmoid(x)
    bce_elem = jnp.maximum(x, 0.0) - x * t + jnp.log1p(e)    # stable BCE-with-logits

    if needs_mask:
        tr = x.shape[1]
        row_ids = jax.lax.broadcasted_iota(jnp.int32, x.shape, 1)
        lane_ids = jax.lax.broadcasted_iota(jnp.int32, x.shape, 2)
        flat = (k * tr + row_ids) * 128 + lane_ids
        valid = flat < d_valid
        bce_elem = jnp.where(valid, bce_elem, 0.0)
        p = jnp.where(valid, p, 0.0)
        # targets are zero-padded, so t and p*t need no extra masking.

    # Pure elementwise (VPU) accumulation in the hot loop; all cross-lane /
    # cross-sublane reductions are deferred to the final grid step.
    bce_acc[...] += bce_elem
    inter_acc[...] += p * t
    p_acc[...] += p
    t_acc[...] += t

    @pl.when(k == pl.num_programs(0) - 1)
    def _finalize():
        n = bce_acc.shape[0]
        smooth = jnp.float32(1e-05)
        bce = jnp.sum(bce_acc[...]) / jnp.float32(n * d_valid)
        inter = jnp.sum(jnp.sum(inter_acc[...], axis=2), axis=1, keepdims=True)  # (N,1)
        p_sum = jnp.sum(jnp.sum(p_acc[...], axis=2), axis=1, keepdims=True)      # (N,1)
        t_sum = jnp.sum(jnp.sum(t_acc[...], axis=2), axis=1, keepdims=True)      # (N,1)
        dice = (2.0 * inter + smooth) / (p_sum + t_sum + smooth)                  # (N,1)
        dice_loss = 1.0 - jnp.sum(dice) / jnp.float32(n)
        o_ref[0, 0] = 0.5 * bce + dice_loss


def bce_dice_loss(logits, targets):
    n = logits.shape[0]
    x = logits.reshape(n, -1)     # native dtype, no cast in the wrapper
    t = targets.reshape(n, -1)
    d = x.shape[1]

    # Lane-dense (N, R, 128) layout so every vreg is fully packed.
    r_total = _round_up(d, 128) // 128

    try:
        vmem_phys = pltpu.get_tpu_info().vmem_capacity_bytes
    except Exception:
        vmem_phys = 64 << 20      # conservative (v7x) fallback

    itemsize = max(jnp.dtype(x.dtype).itemsize, jnp.dtype(t.dtype).itemsize)
    tile_rows = _pick_tile_rows(n, r_total, itemsize, vmem_phys)
    r_pad = _round_up(r_total, tile_rows)
    d_pad = r_pad * 128

    needs_mask = d_pad != d
    if needs_mask:
        x = jnp.pad(x, ((0, 0), (0, d_pad - d)))
        t = jnp.pad(t, ((0, 0), (0, d_pad - d)))
    x3 = x.reshape(n, r_pad, 128)
    t3 = t.reshape(n, r_pad, 128)

    grid = (r_pad // tile_rows,)
    kernel = functools.partial(bce_dice_kernel, d_valid=d, needs_mask=needs_mask)

    out = pl.pallas_call(
        kernel,
        out_shape=jax.ShapeDtypeStruct((1, 1), jnp.float32),
        grid=grid,
        in_specs=[
            pl.BlockSpec((n, tile_rows, 128), lambda k: (0, k, 0)),
            pl.BlockSpec((n, tile_rows, 128), lambda k: (0, k, 0)),
        ],
        out_specs=pl.BlockSpec(memory_space=pltpu.MemorySpace.SMEM),
        scratch_shapes=[pltpu.VMEM((n, tile_rows, 128), jnp.float32)] * 4,
        compiler_params=pltpu.CompilerParams(
            dimension_semantics=("arbitrary",),
            vmem_limit_bytes=min(vmem_phys // 4, 32 << 20),
        ),
    )(x3, t3)
    return out[0, 0]


def bce_dice_loss_ref(logits, targets):
    # pure-JAX reference, mirrors the PyTorch module exactly
    x = logits.astype(jnp.float32)
    t = targets.astype(jnp.float32)
    bce = jnp.mean(jnp.maximum(x, 0.0) - x * t + jnp.log(1.0 + jnp.exp(-jnp.abs(x))))
    smooth = 1e-05
    n = x.shape[0]
    p = jax.nn.sigmoid(x).reshape(n, -1)
    tt = t.reshape(n, -1)
    inter = jnp.sum(p * tt, axis=1)
    dice = (2.0 * inter + smooth) / (jnp.sum(p, axis=1) + jnp.sum(tt, axis=1) + smooth)
    dice = 1.0 - jnp.sum(dice) / n
    return 0.5 * bce + dice


if __name__ == "__main__":
    key = jax.random.PRNGKey(0)
    k1, k2 = jax.random.split(key)

    # NCHW, small shapes: batch=2, channels=4, spatial=16  -> D = 4*16*16 = 1024
    shape = (2, 4, 16, 16)
    logits = jax.random.normal(k1, shape, dtype=jnp.float32)
    targets = (jax.random.uniform(k2, shape, dtype=jnp.float32) > 0.5).astype(jnp.float32)

    loss = bce_dice_loss(logits, targets)
    loss = jax.block_until_ready(loss)

    ref = bce_dice_loss_ref(logits, targets)
    assert jnp.allclose(loss, ref, atol=1e-5, rtol=1e-5), (loss, ref)

    print("KERNEL_OK")
</pallas_src>

<mosaic_0001>
module attributes {stable_mosaic.version = 11 : i64} {
  func.func @bce_dice_kernel(%arg0: i32, %arg1: memref<2x8x128xf32, #tpu.memory_space<vmem>>, %arg2: memref<2x8x128xf32, #tpu.memory_space<vmem>>, %arg3: memref<1x1xf32, #tpu.memory_space<smem>>, %arg4: memref<2x8x128xf32, #tpu.memory_space<vmem>>, %arg5: memref<2x8x128xf32, #tpu.memory_space<vmem>>, %arg6: memref<2x8x128xf32, #tpu.memory_space<vmem>>, %arg7: memref<2x8x128xf32, #tpu.memory_space<vmem>>) attributes {dimension_semantics = [#tpu.dimension_semantics<arbitrary>], iteration_bounds = array<i64: 1>, scalar_prefetch = 0 : i64, scratch_operands = 4 : i64, tpu.core_type = #tpu.core_type<tc>, window_params = [{transform_indices = @transform_0, window_bounds = array<i64: 2, 8, 128>}, {transform_indices = @transform_1, window_bounds = array<i64: 2, 8, 128>}, {transform_indices = @transform_2, window_bounds = array<i64: 1, 1>}]} {
    %c0_i32 = arith.constant 0 : i32
    %0 = arith.cmpi eq, %arg0, %c0_i32 : i32
    %1 = arith.extui %0 : i1 to i32
    %c0_i32_0 = arith.constant 0 : i32
    %2 = arith.cmpi ne, %1, %c0_i32_0 : i32
    scf.if %2 {
      %cst_36 = arith.constant 0.000000e+00 : f32
      %39 = vector.broadcast %cst_36 : f32 to vector<2x8x128xf32>
      %c0_37 = arith.constant 0 : index
      %c0_38 = arith.constant 0 : index
      %c0_39 = arith.constant 0 : index
      %40 = vector.load %arg4[%c0_37, %c0_38, %c0_39] : memref<2x8x128xf32, #tpu.memory_space<vmem>>, vector<2x8x128xf32>
      tpu.vector_store %arg4[%c0_37, %c0_38, %c0_39], %39 {strides = array<i32>} : memref<2x8x128xf32, #tpu.memory_space<vmem>>, vector<2x8x128xf32>,
      %cst_40 = arith.constant 0.000000e+00 : f32
      %41 = vector.broadcast %cst_40 : f32 to vector<2x8x128xf32>
      %c0_41 = arith.constant 0 : index
      %c0_42 = arith.constant 0 : index
      %c0_43 = arith.constant 0 : index
      %42 = vector.load %arg5[%c0_41, %c0_42, %c0_43] : memref<2x8x128xf32, #tpu.memory_space<vmem>>, vector<2x8x128xf32>
      tpu.vector_store %arg5[%c0_41, %c0_42, %c0_43], %41 {strides = array<i32>} : memref<2x8x128xf32, #tpu.memory_space<vmem>>, vector<2x8x128xf32>,
      %cst_44 = arith.constant 0.000000e+00 : f32
      %43 = vector.broadcast %cst_44 : f32 to vector<2x8x128xf32>
      %c0_45 = arith.constant 0 : index
      %c0_46 = arith.constant 0 : index
      %c0_47 = arith.constant 0 : index
      %44 = vector.load %arg6[%c0_45, %c0_46, %c0_47] : memref<2x8x128xf32, #tpu.memory_space<vmem>>, vector<2x8x128xf32>
      tpu.vector_store %arg6[%c0_45, %c0_46, %c0_47], %43 {strides = array<i32>} : memref<2x8x128xf32, #tpu.memory_space<vmem>>, vector<2x8x128xf32>,
      %cst_48 = arith.constant 0.000000e+00 : f32
      %45 = vector.broadcast %cst_48 : f32 to vector<2x8x128xf32>
      %c0_49 = arith.constant 0 : index
      %c0_50 = arith.constant 0 : index
      %c0_51 = arith.constant 0 : index
      %46 = vector.load %arg7[%c0_49, %c0_50, %c0_51] : memref<2x8x128xf32, #tpu.memory_space<vmem>>, vector<2x8x128xf32>
      tpu.vector_store %arg7[%c0_49, %c0_50, %c0_51], %45 {strides = array<i32>} : memref<2x8x128xf32, #tpu.memory_space<vmem>>, vector<2x8x128xf32>,
    } else {
    }
    %c0 = arith.constant 0 : index
    %c0_1 = arith.constant 0 : index
    %c0_2 = arith.constant 0 : index
    %3 = vector.load %arg1[%c0, %c0_1, %c0_2] : memref<2x8x128xf32, #tpu.memory_space<vmem>>, vector<2x8x128xf32>
    %c0_3 = arith.constant 0 : index
    %c0_4 = arith.constant 0 : index
    %c0_5 = arith.constant 0 : index
    %4 = vector.load %arg2[%c0_3, %c0_4, %c0_5] : memref<2x8x128xf32, #tpu.memory_space<vmem>>, vector<2x8x128xf32>
    %5 = math.absf %3 : vector<2x8x128xf32>
    %cst = arith.constant 0.000000e+00 : f32
    %6 = vector.broadcast %cst : f32 to vector<2x8x128xf32>
    %7 = arith.subf %6, %5 : vector<2x8x128xf32>
    %8 = math.exp %7 : vector<2x8x128xf32>
    %cst_6 = arith.constant 1.000000e+00 : f32
    %9 = vector.broadcast %cst_6 : f32 to vector<2x8x128xf32>
    %10 = arith.addf %9, %8 : vector<2x8x128xf32>
    %cst_7 = arith.constant 1.000000e+00 : f32
    %11 = vector.broadcast %cst_7 : f32 to vector<2x8x128xf32>
    %12 = arith.divf %11, %10 : vector<2x8x128xf32>
    %cst_8 = arith.constant 0.000000e+00 : f32
    %13 = vector.broadcast %cst_8 : f32 to vector<2x8x128xf32>
    %14 = arith.cmpf oge, %3, %13 : vector<2x8x128xf32>
    %15 = arith.mulf %8, %12 : vector<2x8x128xf32>
    %16 = arith.select %14, %12, %15 : vector<2x8x128xi1>, vector<2x8x128xf32>
    %cst_9 = arith.constant 0.000000e+00 : f32
    %17 = vector.broadcast %cst_9 : f32 to vector<2x8x128xf32>
    %18 = arith.maximumf %3, %17 : vector<2x8x128xf32>
    %19 = arith.mulf %3, %4 : vector<2x8x128xf32>
    %20 = arith.subf %18, %19 : vector<2x8x128xf32>
    %21 = math.log1p %8 : vector<2x8x128xf32>
    %22 = arith.addf %20, %21 : vector<2x8x128xf32>
    %c0_10 = arith.constant 0 : index
    %c0_11 = arith.constant 0 : index
    %c0_12 = arith.constant 0 : index
    %23 = vector.load %arg4[%c0_10, %c0_11, %c0_12] : memref<2x8x128xf32, #tpu.memory_space<vmem>>, vector<2x8x128xf32>
    %24 = arith.addf %23, %22 : vector<2x8x128xf32>
    %c0_13 = arith.constant 0 : index
    %c0_14 = arith.constant 0 : index
    %c0_15 = arith.constant 0 : index
    %25 = vector.load %arg4[%c0_13, %c0_14, %c0_15] : memref<2x8x128xf32, #tpu.memory_space<vmem>>, vector<2x8x128xf32>
    tpu.vector_store %arg4[%c0_13, %c0_14, %c0_15], %24 {strides = array<i32>} : memref<2x8x128xf32, #tpu.memory_space<vmem>>, vector<2x8x128xf32>,
    %c0_16 = arith.constant 0 : index
    %c0_17 = arith.constant 0 : index
    %c0_18 = arith.constant 0 : index
    %26 = vector.load %arg5[%c0_16, %c0_17, %c0_18] : memref<2x8x128xf32, #tpu.memory_space<vmem>>, vector<2x8x128xf32>
    %27 = arith.mulf %16, %4 : vector<2x8x128xf32>
    %28 = arith.addf %26, %27 : vector<2x8x128xf32>
    %c0_19 = arith.constant 0 : index
    %c0_20 = arith.constant 0 : index
    %c0_21 = arith.constant 0 : index
    %29 = vector.load %arg5[%c0_19, %c0_20, %c0_21] : memref<2x8x128xf32, #tpu.memory_space<vmem>>, vector<2x8x128xf32>
    tpu.vector_store %arg5[%c0_19, %c0_20, %c0_21], %28 {strides = array<i32>} : memref<2x8x128xf32, #tpu.memory_space<vmem>>, vector<2x8x128xf32>,
    %c0_22 = arith.constant 0 : index
    %c0_23 = arith.constant 0 : index
    %c0_24 = arith.constant 0 : index
    %30 = vector.load %arg6[%c0_22, %c0_23, %c0_24] : memref<2x8x128xf32, #tpu.memory_space<vmem>>, vector<2x8x128xf32>
    %31 = arith.addf %30, %16 : vector<2x8x128xf32>
    %c0_25 = arith.constant 0 : index
    %c0_26 = arith.constant 0 : index
    %c0_27 = arith.constant 0 : index
    %32 = vector.load %arg6[%c0_25, %c0_26, %c0_27] : memref<2x8x128xf32, #tpu.memory_space<vmem>>, vector<2x8x128xf32>
    tpu.vector_store %arg6[%c0_25, %c0_26, %c0_27], %31 {strides = array<i32>} : memref<2x8x128xf32, #tpu.memory_space<vmem>>, vector<2x8x128xf32>,
    %c0_28 = arith.constant 0 : index
    %c0_29 = arith.constant 0 : index
    %c0_30 = arith.constant 0 : index
    %33 = vector.load %arg7[%c0_28, %c0_29, %c0_30] : memref<2x8x128xf32, #tpu.memory_space<vmem>>, vector<2x8x128xf32>
    %34 = arith.addf %33, %4 : vector<2x8x128xf32>
    %c0_31 = arith.constant 0 : index
    %c0_32 = arith.constant 0 : index
    %c0_33 = arith.constant 0 : index
    %35 = vector.load %arg7[%c0_31, %c0_32, %c0_33] : memref<2x8x128xf32, #tpu.memory_space<vmem>>, vector<2x8x128xf32>
    tpu.vector_store %arg7[%c0_31, %c0_32, %c0_33], %34 {strides = array<i32>} : memref<2x8x128xf32, #tpu.memory_space<vmem>>, vector<2x8x128xf32>,
    %c0_i32_34 = arith.constant 0 : i32
    %36 = arith.cmpi eq, %arg0, %c0_i32_34 : i32
    %37 = arith.extui %36 : i1 to i32
    %c0_i32_35 = arith.constant 0 : i32
    %38 = arith.cmpi ne, %37, %c0_i32_35 : i32
    scf.if %38 {
      %c0_36 = arith.constant 0 : index
      %c0_37 = arith.constant 0 : index
      %c0_38 = arith.constant 0 : index
      %39 = vector.load %arg4[%c0_36, %c0_37, %c0_38] : memref<2x8x128xf32, #tpu.memory_space<vmem>>, vector<2x8x128xf32>
      %40 = vector.shape_cast %39 : vector<2x8x128xf32> to vector<1x2x8x128xf32>
      %cst_39 = arith.constant dense<0.000000e+00> : vector<1xf32>
      %41 = vector.multi_reduction <add>, %40, %cst_39 [1, 2, 3] : vector<1x2x8x128xf32> to vector<1xf32>
      %42 = vector.shape_cast %41 : vector<1xf32> to vector<1x1x1x1xf32>
      %43 = vector.extract %42[0, 0, 0, 0] : f32 from vector<1x1x1x1xf32>
      %cst_40 = arith.constant 2.048000e+03 : f32
      %44 = arith.divf %43, %cst_40 : f32
      %c0_41 = arith.constant 0 : index
      %c0_42 = arith.constant 0 : index
      %c0_43 = arith.constant 0 : index
      %45 = vector.load %arg5[%c0_41, %c0_42, %c0_43] : memref<2x8x128xf32, #tpu.memory_space<vmem>>, vector<2x8x128xf32>
      %cst_44 = arith.constant dense<0.000000e+00> : vector<2x8xf32>
      %46 = vector.multi_reduction <add>, %45, %cst_44 [2] : vector<2x8x128xf32> to vector<2x8xf32>
      %cst_45 = arith.constant dense<0.000000e+00> : vector<2xf32>
      %47 = vector.multi_reduction <add>, %46, %cst_45 [1] : vector<2x8xf32> to vector<2xf32>
      %48 = vector.shape_cast %47 : vector<2xf32> to vector<2x1xf32>
      %c0_46 = arith.constant 0 : index
      %c0_47 = arith.constant 0 : index
      %c0_48 = arith.constant 0 : index
      %49 = vector.load %arg6[%c0_46, %c0_47, %c0_48] : memref<2x8x128xf32, #tpu.memory_space<vmem>>, vector<2x8x128xf32>
      %cst_49 = arith.constant dense<0.000000e+00> : vector<2x8xf32>
      %50 = vector.multi_reduction <add>, %49, %cst_49 [2] : vector<2x8x128xf32> to vector<2x8xf32>
      %cst_50 = arith.constant dense<0.000000e+00> : vector<2xf32>
      %51 = vector.multi_reduction <add>, %50, %cst_50 [1] : vector<2x8xf32> to vector<2xf32>
      %52 = vector.shape_cast %51 : vector<2xf32> to vector<2x1xf32>
      %c0_51 = arith.constant 0 : index
      %c0_52 = arith.constant 0 : index
      %c0_53 = arith.constant 0 : index
      %53 = vector.load %arg7[%c0_51, %c0_52, %c0_53] : memref<2x8x128xf32, #tpu.memory_space<vmem>>, vector<2x8x128xf32>
      %cst_54 = arith.constant dense<0.000000e+00> : vector<2x8xf32>
      %54 = vector.multi_reduction <add>, %53, %cst_54 [2] : vector<2x8x128xf32> to vector<2x8xf32>
      %cst_55 = arith.constant dense<0.000000e+00> : vector<2xf32>
      %55 = vector.multi_reduction <add>, %54, %cst_55 [1] : vector<2x8xf32> to vector<2xf32>
      %56 = vector.shape_cast %55 : vector<2xf32> to vector<2x1xf32>
      %cst_56 = arith.constant 2.000000e+00 : f32
      %57 = vector.broadcast %cst_56 : f32 to vector<2x1xf32>
      %58 = arith.mulf %57, %48 : vector<2x1xf32>
      %cst_57 = arith.constant 9.99999974E-6 : f32
      %59 = vector.broadcast %cst_57 : f32 to vector<2x1xf32>
      %60 = arith.addf %58, %59 : vector<2x1xf32>
      %61 = arith.addf %52, %56 : vector<2x1xf32>
      %cst_58 = arith.constant 9.99999974E-6 : f32
      %62 = vector.broadcast %cst_58 : f32 to vector<2x1xf32>
      %63 = arith.addf %61, %62 : vector<2x1xf32>
      %64 = arith.divf %60, %63 : vector<2x1xf32>
      %65 = vector.shape_cast %64 : vector<2x1xf32> to vector<1x2x1xf32>
      %cst_59 = arith.constant dense<0.000000e+00> : vector<1xf32>
      %66 = vector.multi_reduction <add>, %65, %cst_59 [1, 2] : vector<1x2x1xf32> to vector<1xf32>
      %67 = vector.shape_cast %66 : vector<1xf32> to vector<1x1x1xf32>
      %68 = vector.extract %67[0, 0, 0] : f32 from vector<1x1x1xf32>
      %cst_60 = arith.constant 2.000000e+00 : f32
      %69 = arith.divf %68, %cst_60 : f32
      %cst_61 = arith.constant 1.000000e+00 : f32
      %70 = arith.subf %cst_61, %69 : f32
      %cst_62 = arith.constant 5.000000e-01 : f32
      %71 = arith.mulf %cst_62, %44 : f32
      %72 = arith.addf %71, %70 : f32
      %c0_63 = arith.constant 0 : index
      %c0_64 = arith.constant 0 : index
      %73 = memref.load %arg3[%c0_63, %c0_64] : memref<1x1xf32, #tpu.memory_space<smem>>
      memref.store %72, %arg3[%c0_63, %c0_64] : memref<1x1xf32, #tpu.memory_space<smem>>
    } else {
    }
    return
  }
  func.func @transform_0(%arg0: i32) -> (i32, i32, i32) {
    %c0_i32 = arith.constant 0 : i32
    %c0_i32_0 = arith.constant 0 : i32
    %c0_i32_1 = arith.constant 0 : i32
    return %c0_i32, %arg0, %c0_i32_0 : i32, i32, i32
  }
  func.func @transform_1(%arg0: i32) -> (i32, i32, i32) {
    %c0_i32 = arith.constant 0 : i32
    %c0_i32_0 = arith.constant 0 : i32
    %c0_i32_1 = arith.constant 0 : i32
    return %c0_i32, %arg0, %c0_i32_0 : i32, i32, i32
  }
  func.func @transform_2(%arg0: i32) -> (i32, i32) {
    %c0_i32 = arith.constant 0 : i32
    %c0_i32_0 = arith.constant 0 : i32
    %c0_i32_1 = arith.constant 0 : i32
    return %c0_i32, %c0_i32_0 : i32, i32
  }
}

</mosaic_0001>

<bundles_post_ra>
// kernel: tpu_custom_call.1
= control target key start
LH: loop header
LB: loop body
LE: loop exit
PB: predicated region body
PF: predicated region fallthrough
CT: control target
= control target key end

     0   :  { %7 = vsyncpa [#allocation7], 0  ;;  %s396_s0 = inlined_call_operand.hbm [shape: f32[2,8,128], index: 0, kind: input, shape index: {}]   ;;  %s397_s1 = inlined_call_operand.hbm [shape: f32[2,8,128], index: 1, kind: input, shape index: {}]   ;;  %s398_s2 = inlined_call_operand.hbm [shape: f32[1,1], index: 2, kind: output, shape index: {}]  }
   0x1   :  { %8 = vsyncpa [#allocation10], 0 }
   0x2   :  { %9 = vsyncpa [#allocation8], 0  ;;  %s330_s9 = smov [#allocation6]  }
   0x3   :  { %s15_s10 = sshll.u32 %s330_s9, 4  ;;  %s16_s10 = int_to_ptr.vmem [resolvable:$true] %s15_s10 }
   0x4   :  { %s284_s11 = scalar_lea.vmem %s16_s10, 256  ;;  %p289_p1 = scmp.lt.s32.totalorder %s16_s10, %s16_s10 }
   0x5   :  { %p285_p0 = scmp.ne.s32.totalorder %s16_s10, %s284_s11  ;;  %p290_p2 = scmp.lt.s32.totalorder %s284_s11, %s284_s11 }
   0x7   :  { %p291_p3 = por %p290_p2, %p289_p1 }
   0x9   :  { %p292_p4 = pnand %p291_p3, %p285_p0 }
   0xb   :  { %295 = shalt.err (!%p292_p4)
}
   0xc   :  { %s331_s12 = smov 128   ;;  %s332_s13 = smov 8  }
   0xd   :  { %21 = dma.hbm_to_vmem [thread:$0]  %s396_s0, 256, %s16_s10, [#allocation7], %s331_s12, %s331_s12, %s332_s13  }
   0xe   :  { %s333_s16 = smov [#allocation9]  }
   0xf   :  { %s27_s17 = sshll.u32 %s333_s16, 4  ;;  %s28_s17 = int_to_ptr.vmem [resolvable:$true] %s27_s17 }
  0x10   :  { %s304_s18 = scalar_lea.vmem %s28_s17, 256  ;;  %p309_p6 = scmp.lt.s32.totalorder %s28_s17, %s28_s17 }
  0x11   :  { %p305_p5 = scmp.ne.s32.totalorder %s28_s17, %s304_s18  ;;  %p310_p7 = scmp.lt.s32.totalorder %s304_s18, %s304_s18 }
  0x13   :  { %p311_p8 = por %p310_p7, %p309_p6 }
  0x15   :  { %p312_p9 = pnand %p311_p8, %p305_p5 }
  0x17   :  { %315 = shalt.err (!%p312_p9)
}
  0x18   :  { %33 = dma.hbm_to_vmem [thread:$0]  %s397_s1, 256, %s28_s17, [#allocation10], %s331_s12, %s331_s12, %s332_s13  }
  0x19   :  { %324 = dma.done.wait [#allocation7], 256  }
  0x1a   :  { %325 = vsyncadd [#allocation7], 4294967040 }
  0x1b   :  { %326 = dma.done.wait [#allocation10], 256  }
  0x1c   :  { %327 = vsyncadd [#allocation10], 4294967040  ;;  %v356_v0 = vld [vmem:[#allocation9] sm:$0xff]  ;;  %v358_v1 = vld [vmem:[#allocation6] sm:$0xff]  ;;  %v154_v22 = vlaneseq  ;;  %vm164_vm2 = vcmask 1041409   ;;  %vm167_vm3 = vcmask 58368  }
  0x1d   :  { %194 = vadd.xlane.f32.xlu1 %v356_v0  ;;  %v56_v2 = vand.u32 2147483647, %v358_v1  ;;  %v362_v3 = vld [vmem:[#allocation6 + $0x8] sm:$0xff]  ;;  %v55_v4 = vld [vmem:[#allocation9 + $0x8] sm:$0xff]  ;;  %vm70_vm0 = vcmp.ge.f32.partialorder %v358_v1, 0.0  ;;  %v78_v44 = vmul.f32 %v356_v0, %v358_v1  ;;  %v76_v48 = vmax.f32 %v358_v1, 0.0 }
  0x1e   :  { %v57_v5 = vand.u32 2147483647, %v362_v3  ;;  %vm71_vm1 = vcmp.ge.f32.partialorder %v362_v3, 0.0  ;;  %v155_v23 = vand.u32 127, %v154_v22  ;;  %v157_v24 = vshrl.u32 %v154_v22, 7  ;;  %s334_s26 = smov [#allocation11]  }
  0x1f   :  { %v58_v6 = vsub.f32 0.0, %v56_v2  ;;  %v79_v45 = vmul.f32 %v55_v4, %v362_v3  ;;  %v77_v49 = vmax.f32 %v362_v3, 0.0  ;;  %v80_v56 = vsub.f32 %v76_v48, %v78_v44 }
  0x20   :  { %v59_v7 = vsub.f32 0.0, %v57_v5  ;;  %v158_v25 = vsub.s32 %v155_v23, %v157_v24  ;;  %vm219_vm6 = vcmask 1024  }
  0x21   :  { %v60_v8 = vmul.f32 1.442695, %v58_v6  ;;  %196 = vadd.xlane.f32.xlu1 %v55_v4  ;;  %v81_v57 = vsub.f32 %v77_v49, %v79_v45 }
  0x22   :  { %v62_v9 = vmul.f32 1.442695, %v59_v7 }
  0x23   :  { %262 = vpow2.f32 %v60_v8 }
  0x24   :  { %264 = vpow2.f32 %v62_v9 }
  0x30   :  { %v365_v10 = vpop.eup %262 }
  0x31   :  { %v367_v11 = vpop.eup %264  ;;  %v64_v12 = vadd.f32 1.0, %v365_v10  ;;  %v85_v46 = vmul.f32 -0.5, %v365_v10  ;;  %v88_v51 = vand.u32 2147483647, %v365_v10 }
  0x32   :  { %v65_v13 = vadd.f32 1.0, %v367_v11  ;;  %v94_v47 = vmul.f32 -0.5, %v367_v11  ;;  %v97_v54 = vand.u32 2147483647, %v367_v11 }
  0x33   :  { %266 = vrcp.f32 %v64_v12  ;;  %v86_v50 = vadd.f32 1.0, %v85_v46  ;;  %vm89_vm4 = vcmp.lt.f32.partialorder %v88_v51, 0.0004427343 }
  0x34   :  { %268 = vrcp.f32 %v65_v13  ;;  %v95_v53 = vadd.f32 1.0, %v94_v47  ;;  %vm98_vm5 = vcmp.lt.f32.partialorder %v97_v54, 0.0004427343 }
  0x35   :  { %270 = vlog2.f32 %v64_v12  ;;  %v87_v59 = vmul.f32 %v365_v10, %v86_v50 }
  0x36   :  { %272 = vlog2.f32 %v65_v13  ;;  %v96_v61 = vmul.f32 %v367_v11, %v95_v53 }
  0x40   :  { %v267_v14 = vpop.eup %266 }
  0x41   :  { %v269_v15 = vpop.eup %268  ;;  %v72_v16 = vmul.f32 %v267_v14, %v365_v10 }
  0x42   :  { %v73_v17 = vmul.f32 %v269_v15, %v367_v11  ;;  %v271_v52 = vpop.eup %270 }
  0x43   :  { %v74_v18 = vsel %vm70_vm0, %v267_v14, %v72_v16  ;;  %v273_v55 = vpop.eup %272  ;;  %v84_v58 = vmul.f32 0.6931472, %v271_v52 }
  0x44   :  { %173 = vadd.xlane.f32.xlu0 %v74_v18  ;;  %v75_v19 = vsel %vm71_vm1, %v269_v15, %v73_v17  ;;  %v110_v21 = vmul.f32 %v74_v18, %v356_v0  ;;  %v93_v60 = vmul.f32 0.6931472, %v273_v55 }
  0x45   :  { %v111_v20 = vmul.f32 %v75_v19, %v55_v4  ;;  %v90_v62 = vsel %vm89_vm4, %v87_v59, %v84_v58 }
  0x46   :  { %v99_v63 = vsel %vm98_vm5, %v96_v61, %v93_v60  ;;  %v100_v0 = vadd.f32 %v90_v62, %v80_v56 }
  0x47   :  { %150 = vadd.xlane.f32.xlu1 %v111_v20  ;;  %v101_v1 = vadd.f32 %v99_v63, %v81_v57 }
  0x48   :  { %175 = vadd.xlane.f32.xlu0 %v75_v19 }
  0x49   :  { %v133_v2 = vadd.f32 %v101_v1, %v100_v0 }
  0x4c   :  { %148 = vadd.xlane.f32.xlu0 %v110_v21 }
  0xa6   :  { %v195_v26 = vpop.xlane.xlu1 %194 }
  0xa7   :  { %v203_v27 = vrot.slane %v195_v26, %v158_v25 }
  0xaa   :  { %v197_v28 = vpop.xlane.xlu1 %196 }
  0xab   :  { %v207_v29 = vrot.slane %v197_v28, %v158_v25 }
  0xad   :  { %v208_v30 = vsel %vm164_vm2, %v207_v29, %v203_v27 }
  0xae   :  { %v210_v31 = vsel %vm167_vm3, %v208_v30, 0.0 }
  0xaf   :  { %211 = vadd.xlane.f32.xlu1 %v210_v31 }
  0xb3   :  { %134 = vadd.xlane.f32.xlu1 %v133_v2 }
  0xcd   :  { %v174_v32 = vpop.xlane.xlu0 %173 }
  0xce   :  { %v182_v35 = vrot.slane %v174_v32, %v158_v25 }
  0xd0   :  { %v151_v34 = vpop.xlane.xlu1 %150 }
  0xd1   :  { %v176_v33 = vpop.xlane.xlu0 %175  ;;  %v163_v38 = vrot.slane %v151_v34, %v158_v25 }
  0xd2   :  { %v186_v36 = vrot.slane %v176_v33, %v158_v25 }
  0xd4   :  { %v187_v37 = vsel %vm164_vm2, %v186_v36, %v182_v35 }
  0xd5   :  { %v189_v39 = vsel %vm167_vm3, %v187_v37, 0.0  ;;  %v149_v40 = vpop.xlane.xlu0 %148 }
  0xd6   :  { %190 = vadd.xlane.f32.xlu0 %v189_v39  ;;  %v159_v41 = vrot.slane %v149_v40, %v158_v25 }
  0xd8   :  { %v165_v42 = vsel %vm164_vm2, %v163_v38, %v159_v41 }
  0xd9   :  { %v168_v43 = vsel %vm167_vm3, %v165_v42, 0.0 }
  0xda   :  { %169 = vadd.xlane.f32.xlu0 %v168_v43 }
 0x138   :  { %v212_v3 = vpop.xlane.xlu1 %211 }
 0x13c   :  { %v135_v11 = vpop.xlane.xlu1 %134 }
 0x13d   :  { %v136_v14 = vrot.slane %v135_v11, 4 }
 0x13f   :  { %v137_v15 = vadd.f32 %v136_v14, %v135_v11 }
 0x141   :  { %v138_v16 = vrot.slane %v137_v15, 2 }
 0x143   :  { %v139_v17 = vadd.f32 %v138_v16, %v137_v15 }
 0x145   :  { %v140_v18 = vrot.slane %v139_v17, 1 }
 0x147   :  { %v141_v19 = vadd.f32 %v140_v18, %v139_v17 }
 0x149   :  { %253 = vpush %v141_v19 }
 0x15f   :  { %v191_v4 = vpop.xlane.xlu0 %190 }
 0x160   :  { %v215_v5 = vadd.f32 %v212_v3, %v191_v4 }
 0x162   :  { %v216_v6 = vadd.f32 1e-05, %v215_v5 }
 0x163   :  { %v170_v7 = vpop.xlane.xlu0 %169 }
 0x164   :  { %274 = vrcp.f32 %v216_v6  ;;  %v213_v8 = vmul.f32 2.0, %v170_v7 }
 0x166   :  { %v214_v9 = vadd.f32 1e-05, %v213_v8 }
 0x171   :  { %v275_v10 = vpop.eup %274 }
 0x172   :  { %v218_v12 = vmul.f32 %v275_v10, %v214_v9 }
 0x174   :  { %v220_v13 = vsel %vm219_vm6, %v218_v12, 0.0 }
 0x175   :  { %221 = vadd.xlane.f32.xlu0 %v220_v13 }
 0x17a   :  { %s254_s0 = spop %253 }
 0x17b   :  { %s145_s1 = smul.f32 0.00048828125, %s254_s0 }
 0x17d   :  { %s234_s23 = smul.f32 0.5, %s145_s1 }
 0x1fe   :  { %v222_v20 = vpop.xlane.xlu0 %221 }
 0x1ff   :  { %v223_v21 = vrot.slane %v222_v20, 4 }
 0x201   :  { %v224_v22 = vadd.f32 %v223_v21, %v222_v20 }
 0x203   :  { %v225_v23 = vrot.slane %v224_v22, 2 }
 0x205   :  { %v226_v24 = vadd.f32 %v225_v23, %v224_v22 }
 0x207   :  { %v227_v25 = vrot.slane %v226_v24, 1 }
 0x209   :  { %v228_v26 = vadd.f32 %v227_v25, %v226_v24 }
 0x20b   :  { %255 = vpush %v228_v26 }
 0x23c   :  { %s256_s21 = spop %255 }
 0x23d   :  { %s232_s22 = smul.f32 0.5, %s256_s21 }
 0x23f   :  { %s233_s24 = ssub.f32 1.0, %s232_s22 }
 0x241   :  { %s235_s25 = sadd.f32 %s234_s23, %s233_s24 }
 0x243   :  { %237 = sst [smem:[#allocation11]] %s235_s25 }
 0x244   :  { %245 = dma.smem_to_hbm %s334_s26, 16, %s398_s2, [#allocation8]  }
 0x245   :  { %328 = dma.done.wait [#allocation8], 16  }
 0x246   :  { %329 = vsyncadd [#allocation8], 4294967280 }
 0x247   :  { %249 = sfence }
 0x248   :  { %250 = vsyncpa [#allocation7], 1 }
 0x249   :  { %251 = vsyncpa [#allocation10], 1 }
 0x24a   :  { %252 = vsyncpa [#allocation8], 1 }

</bundles_post_ra>
